<compile_context>
chip_gen: v7x
topology: tpu7x:2x2x1
jax: 0.10.0
libtpu: 0.0.40
codegen_flags: <defaults>
</compile_context>

<pallas_src>
import functools

import jax
import jax.numpy as jnp
from jax.experimental import pallas as pl
from jax.experimental.pallas import tpu as pltpu

EMBEDDING_DIM = 100
BLOCK_SIZE = 64  # max sequence length (tril buffer size in the module)


def _head_kernel(x_ref, w_ref, o_ref, *, scale, head_pad):
    # x_ref: (BB, T, Cp)   zero-padded activations
    # w_ref: (Cp, 3*Hp)    fused, zero-padded [Wq | Wk | Wv]
    # o_ref: (BB, T, Hp)   lane-dense output (Hp multiple of 128)
    BB, T, Cp = x_ref.shape
    Hp = head_pad

    x = x_ref[...]
    w = w_ref[...]

    # ---- fused q/k/v projection: one MXU pass, N = 3*Hp ----
    qkv = jnp.dot(x.reshape(BB * T, Cp), w,
                  preferred_element_type=jnp.float32)          # (BB*T, 3Hp) f32
    qkv = qkv.reshape(BB, T, 3 * Hp)
    q = qkv[:, :, 0 * Hp:1 * Hp]
    k = qkv[:, :, 1 * Hp:2 * Hp]
    v = qkv[:, :, 2 * Hp:3 * Hp]

    # ---- scores: contract the last dims directly (no explicit k transpose) ----
    wei = jnp.einsum('btd,bsd->bts', q, k,
                     preferred_element_type=jnp.float32) * jnp.float32(scale)

    # ---- causal mask, built once and broadcast over the batch block ----
    row = jax.lax.broadcasted_iota(jnp.int32, (T, T), 0)
    col = jax.lax.broadcasted_iota(jnp.int32, (T, T), 1)
    mask = (col <= row)[None, :, :]
    wei = jnp.where(mask, wei, jnp.float32(-1e30))

    # ---- numerically-stable softmax (EUP reciprocal for the normalize) ----
    m = jnp.max(wei, axis=-1, keepdims=True)
    p = jnp.exp(wei - m)
    denom = jnp.sum(p, axis=-1, keepdims=True)
    p = p * pl.reciprocal(denom, approx=True)

    # ---- attention output ----
    out = jnp.einsum('bts,bsd->btd', p, v,
                     preferred_element_type=jnp.float32)       # (BB, T, Hp)
    o_ref[...] = out.astype(o_ref.dtype)


def head_forward(x, wq, wk, wv):
    """x: (B, T, C); wq/wk/wv: (C, H) (transposed nn.Linear weights, bias-free)."""
    B, T, C = x.shape
    H = wq.shape[1]
    assert T <= BLOCK_SIZE

    # Lane-dense padding: C -> Cp, H -> Hp (multiples of 128).  Zero padding is an
    # exact identity for the matmuls; the softmax scale still uses the original C
    # (the reference scales by embedding_dim ** -0.5, not head_size).
    Cp = ((C + 127) // 128) * 128
    Hp = ((H + 127) // 128) * 128

    x_p = jnp.pad(x, ((0, 0), (0, 0), (0, Cp - C)))

    def _pad_w(w):
        return jnp.pad(w, ((0, Cp - C), (0, Hp - H)))

    w_qkv = jnp.concatenate([_pad_w(wq), _pad_w(wk), _pad_w(wv)], axis=1)  # (Cp, 3Hp)

    # Batch blocking: at most 2 grid steps, each handling BB = ceil(B/2) batches,
    # so per-step pipeline overhead is amortized while v7x's two TensorCores still
    # get an even "parallel" split when B >= 2.
    num_blocks = 2 if B >= 2 else 1
    BB = pl.cdiv(B, num_blocks)
    B_pad = BB * num_blocks
    if B_pad != B:
        x_p = jnp.pad(x_p, ((0, B_pad - B), (0, 0), (0, 0)))

    kernel = functools.partial(_head_kernel, scale=float(C) ** -0.5, head_pad=Hp)

    out_p = pl.pallas_call(
        kernel,
        out_shape=jax.ShapeDtypeStruct((B_pad, T, Hp), x.dtype),
        grid_spec=pltpu.PrefetchScalarGridSpec(
            num_scalar_prefetch=0,
            grid=(num_blocks,),
            in_specs=[
                pl.BlockSpec((BB, T, Cp), lambda b: (b, 0, 0)),
                pl.BlockSpec((Cp, 3 * Hp), lambda b: (0, 0)),
            ],
            out_specs=pl.BlockSpec((BB, T, Hp), lambda b: (b, 0, 0)),
        ),
        compiler_params=pltpu.CompilerParams(
            dimension_semantics=("parallel",),
        ),
    )(x_p, w_qkv)

    # Strip batch / head padding back to the logical shape.
    return out_p[:B, :, :H]


def _reference(x, wq, wk, wv):
    # pure-JAX reference mirroring the PyTorch forward exactly
    B, T, C = x.shape
    q = x @ wq
    k = x @ wk
    v = x @ wv
    wei = (q @ jnp.swapaxes(k, -2, -1)) * (C ** -0.5)
    mask = jnp.tril(jnp.ones((T, T), dtype=bool))
    wei = jnp.where(mask, wei, -jnp.inf)
    wei = jax.nn.softmax(wei, axis=-1)
    return wei @ v


if __name__ == "__main__":
    key = jax.random.PRNGKey(0)
    k_x, k_q, k_k, k_v = jax.random.split(key, 4)

    B, T, C = 2, 8, EMBEDDING_DIM
    head_size = 32

    x = jax.random.normal(k_x, (B, T, C), dtype=jnp.float32)
    # deterministic nn.Linear-style init (uniform in +/- 1/sqrt(fan_in)),
    # stored already transposed as (C, head_size)
    bound = 1.0 / (C ** 0.5)
    wq = jax.random.uniform(k_q, (C, head_size), jnp.float32, -bound, bound)
    wk = jax.random.uniform(k_k, (C, head_size), jnp.float32, -bound, bound)
    wv = jax.random.uniform(k_v, (C, head_size), jnp.float32, -bound, bound)

    out = head_forward(x, wq, wk, wv)
    out = jax.block_until_ready(out)

    ref = _reference(x, wq, wk, wv)
    assert out.shape == (B, T, head_size)
    # tolerance accounts for the EUP approx-reciprocal in the softmax normalize
    assert jnp.allclose(out, ref, atol=2e-3, rtol=2e-3)

    print("KERNEL_OK")
</pallas_src>

<mosaic_0001>
module attributes {stable_mosaic.version = 11 : i64} {
  func.func @_head_kernel(%arg0: i32, %arg1: memref<1x8x128xf32, #tpu.memory_space<vmem>>, %arg2: memref<128x384xf32, #tpu.memory_space<vmem>>, %arg3: memref<1x8x128xf32, #tpu.memory_space<vmem>>) attributes {dimension_semantics = [#tpu.dimension_semantics<parallel>], iteration_bounds = array<i64: 2>, scalar_prefetch = 0 : i64, scratch_operands = 0 : i64, tpu.core_type = #tpu.core_type<tc>, window_params = [{transform_indices = @transform_0, window_bounds = array<i64: 1, 8, 128>}, {pipeline_mode = #tpu.pipeline_mode<synchronous>, transform_indices = @transform_1, window_bounds = array<i64: 128, 384>}, {transform_indices = @transform_2, window_bounds = array<i64: 1, 8, 128>}]} {
    %c0 = arith.constant 0 : index
    %c0_0 = arith.constant 0 : index
    %c0_1 = arith.constant 0 : index
    %0 = vector.load %arg1[%c0, %c0_0, %c0_1] : memref<1x8x128xf32, #tpu.memory_space<vmem>>, vector<1x8x128xf32>
    %c0_2 = arith.constant 0 : index
    %c0_3 = arith.constant 0 : index
    %1 = vector.load %arg2[%c0_2, %c0_3] : memref<128x384xf32, #tpu.memory_space<vmem>>, vector<128x384xf32>
    %2 = vector.shape_cast %0 : vector<1x8x128xf32> to vector<8x128xf32>
    %cst = arith.constant dense<0.000000e+00> : vector<8x384xf32>
    %3 = tpu.matmul %2, %1, %cst {dimension_numbers = #tpu.dot_dimension_numbers<[1], [0], [0], [1], [0, 0, 1, 1], [], []>} : vector<8x128xf32>, vector<128x384xf32>, vector<8x384xf32> -> vector<8x384xf32>
    %4 = vector.shape_cast %3 : vector<8x384xf32> to vector<1x8x384xf32>
    %5 = vector.extract_strided_slice %4 {offsets = [0, 0, 0], sizes = [1, 8, 128], strides = [1, 1, 1]} : vector<1x8x384xf32> to vector<1x8x128xf32>
    %6 = vector.extract_strided_slice %4 {offsets = [0, 0, 128], sizes = [1, 8, 128], strides = [1, 1, 1]} : vector<1x8x384xf32> to vector<1x8x128xf32>
    %7 = vector.extract_strided_slice %4 {offsets = [0, 0, 256], sizes = [1, 8, 128], strides = [1, 1, 1]} : vector<1x8x384xf32> to vector<1x8x128xf32>
    "tpu.trace_start"() <{level = 10 : i32, message = "btd,bsd->bts"}> : () -> ()
    %cst_4 = arith.constant dense<0.000000e+00> : vector<1x8x8xf32>
    %8 = tpu.matmul %5, %6, %cst_4 {dimension_numbers = #tpu.dot_dimension_numbers<[2], [2], [1], [1], [0, 0, 0, 1, 1, 1], [0], [0]>} : vector<1x8x128xf32>, vector<1x8x128xf32>, vector<1x8x8xf32> -> vector<1x8x8xf32>
    "tpu.trace_stop"() : () -> ()
    %cst_5 = arith.constant 1.000000e-01 : f32
    %9 = vector.broadcast %cst_5 : f32 to vector<1x8x8xf32>
    %10 = arith.mulf %8, %9 : vector<1x8x8xf32>
    %11 = tpu.iota {dimensions = array<i32: 0>} : vector<8x8xi32>
    %12 = tpu.iota {dimensions = array<i32: 1>} : vector<8x8xi32>
    %13 = arith.cmpi sle, %12, %11 : vector<8x8xi32>
    %14 = vector.shape_cast %13 : vector<8x8xi1> to vector<1x8x8xi1>
    %cst_6 = arith.constant -1.000000e+30 : f32
    %15 = vector.broadcast %cst_6 : f32 to vector<1x8x8xf32>
    %16 = arith.select %14, %10, %15 : vector<1x8x8xi1>, vector<1x8x8xf32>
    %cst_7 = arith.constant dense<0xFF800000> : vector<1x8xf32>
    %17 = vector.multi_reduction <maximumf>, %16, %cst_7 [2] : vector<1x8x8xf32> to vector<1x8xf32>
    %18 = vector.shape_cast %17 : vector<1x8xf32> to vector<1x8x1xf32>
    %19 = vector.broadcast %18 : vector<1x8x1xf32> to vector<1x8x8xf32>
    %20 = arith.subf %16, %19 : vector<1x8x8xf32>
    %21 = math.exp %20 : vector<1x8x8xf32>
    %cst_8 = arith.constant dense<0.000000e+00> : vector<1x8xf32>
    %22 = vector.multi_reduction <add>, %21, %cst_8 [2] : vector<1x8x8xf32> to vector<1x8xf32>
    %23 = vector.shape_cast %22 : vector<1x8xf32> to vector<1x8x1xf32>
    %24 = tpu.reciprocal %23 {approx = true} : vector<1x8x1xf32> -> vector<1x8x1xf32>
    %25 = vector.broadcast %24 : vector<1x8x1xf32> to vector<1x8x8xf32>
    %26 = arith.mulf %21, %25 : vector<1x8x8xf32>
    "tpu.trace_start"() <{level = 10 : i32, message = "bts,bsd->btd"}> : () -> ()
    %cst_9 = arith.constant dense<0.000000e+00> : vector<1x8x128xf32>
    %27 = tpu.matmul %26, %7, %cst_9 {dimension_numbers = #tpu.dot_dimension_numbers<[2], [1], [1], [2], [0, 0, 0, 1, 1, 2], [0], [0]>} : vector<1x8x8xf32>, vector<1x8x128xf32>, vector<1x8x128xf32> -> vector<1x8x128xf32>
    "tpu.trace_stop"() : () -> ()
    %c0_10 = arith.constant 0 : index
    %c0_11 = arith.constant 0 : index
    %c0_12 = arith.constant 0 : index
    %28 = vector.load %arg3[%c0_10, %c0_11, %c0_12] : memref<1x8x128xf32, #tpu.memory_space<vmem>>, vector<1x8x128xf32>
    tpu.vector_store %arg3[%c0_10, %c0_11, %c0_12], %27 {strides = array<i32>} : memref<1x8x128xf32, #tpu.memory_space<vmem>>, vector<1x8x128xf32>,
    return
  }
  func.func @transform_0(%arg0: i32) -> (i32, i32, i32) {
    %c0_i32 = arith.constant 0 : i32
    %c0_i32_0 = arith.constant 0 : i32
    %c0_i32_1 = arith.constant 0 : i32
    return %arg0, %c0_i32, %c0_i32_0 : i32, i32, i32
  }
  func.func @transform_1(%arg0: i32) -> (i32, i32) {
    %c0_i32 = arith.constant 0 : i32
    %c0_i32_0 = arith.constant 0 : i32
    %c0_i32_1 = arith.constant 0 : i32
    return %c0_i32, %c0_i32_0 : i32, i32
  }
  func.func @transform_2(%arg0: i32) -> (i32, i32, i32) {
    %c0_i32 = arith.constant 0 : i32
    %c0_i32_0 = arith.constant 0 : i32
    %c0_i32_1 = arith.constant 0 : i32
    return %arg0, %c0_i32, %c0_i32_0 : i32, i32, i32
  }
}

</mosaic_0001>

<bundles_post_ra>
// kernel: tpu_custom_call.1
= control target key start
LH: loop header
LB: loop body
LE: loop exit
PB: predicated region body
PF: predicated region fallthrough
CT: control target
= control target key end

     0   :  { %7 = vsyncpa [#allocation3], 0  ;;  %s1192_s0 = inlined_call_operand.hbm [shape: f32[2,8,128], index: 0, kind: input, shape index: {}]   ;;  %s1193_s1 = inlined_call_operand.hbm [shape: f32[128,384], index: 1, kind: input, shape index: {}]   ;;  %s1194_s2 = inlined_call_operand.hbm [shape: f32[2,8,128], index: 2, kind: output, shape index: {}]  }
   0x1   :  { %9 = vsyncpa [#allocation3 + $0x1], 0 }
   0x2   :  { %10 = vsyncpa [#allocation6], 0 }
   0x3   :  { %11 = vsyncpa [#allocation4], 0 }
   0x4   :  { %13 = vsyncpa [#allocation4 + $0x1], 0  ;;  %s977_s9 = smov 0   ;;  %s979_s10 = smov 0  }
   0x5   :  { %s981_s11 = smov 0   ;;  %s983_s12 = smov 0  }
   0x6 LB: > { %s998_s13 = sadd.s32 4294967295, %s952_s12   ;;  %s621_s14 = sadd.s32 4294967294, %s952_s12   ;;  %s952_s12 = sphi %s983_s12, %s1214_s12   ;;  %s948_s11 = sphi %s981_s11, %s1213_s11   ;;  %s944_s10 = sphi %s979_s10, %s1212_s10   ;;  %s940_s9 = sphi %s977_s9, %s1211_s9  }
   0x7   : > { %p39_p0 = scmp.ne.s32.totalorder %s944_s10, %s940_s9  ;;  %p1195_p1 = scmp.eq.s32.totalorder %s998_s13, 0 }
   0x8   : > { %p90_p3 = scmp.eq.s32.totalorder %s621_s14, 1  ;;  %p622_p5 = scmp.ge.s32.totalorder %s952_s12, 1 }
   0x9   : > { %p1007_p4 = por %p1195_p1, %p39_p0  ;;  %p97_p7 = scmp.lt.s32.totalorder %s952_s12, 3 }
   0xa   : > { %p1012_p6 = por %p90_p3, %p39_p0  ;;  %s954_s18 = smov [#allocation5]  }
   0xb   : > { %s1198_s15 = scalar_select %p1007_p4, 1, 0 }
   0xc   : > { %s1199_s16 = scalar_select %p1012_p6, 1, 0 }
   0xd   : > { %p1017_p8 = pnand %p622_p5, %p97_p7  ;;  %s109_s19 = sshll.u32 %s954_s18, 4  ;;  %s1021_s19 = int_to_ptr.vmem [resolvable:$true] %s109_s19 }
   0xe   : > { %s1033_s21 = sadd.s32 1, %s952_s12   ;;  %s26_s22 = sadd.s32 1, %s948_s11 }
   0xf   : > { %s1200_s17 = scalar_select %p1017_p8, 1, 0 }
  0x10   : > { %p766_p9 = pneg %p1017_p8  ;;  %s23_s23 = ssub.s32 %s952_s12, %s1033_s21 }
  0x11   : > { %s824_s26 = scalar_lea.hbm %s1193_s1, 6144 }
  0x12   : > { %p1028_p11 = pnand %p766_p9, %p1195_p1  ;;  %p825_p12 = scmp.ne.s32.totalorder %s1193_s1, %s824_s26 }
  0x13   : > { %p831_p5 = scmp.lt.u32.totalorder %s824_s26, %s1193_s1 }
  0x14   : > { %p826_p13 = pneg %p1028_p11 }
  0x16   : > { %p827_p0 = pnand %p826_p13, %p825_p12 }
  0x18   : > { %p828_p3 = pneg %p827_p0 }
  0x1a   : > { %p833_p7 = pnand %p831_p5, %p828_p3 }
  0x1c   : > { %836 = shalt.err (!%p833_p7)
}
  0x1d   : > { %s837_s3 = scalar_lea.vmem %s1021_s19, 6144  ;;  %p845_p2 = scmp.lt.s32.totalorder %s1021_s19, %s1021_s19 }
  0x1e   : > { %p838_p9 = scmp.ne.s32.totalorder %s1021_s19, %s837_s3  ;;  %p846_p6 = scmp.lt.s32.totalorder %s837_s3, %s837_s3 }
  0x20   : > { %p840_p10 = pnand %p838_p9, %p826_p13  ;;  %p847_p4 = por %p846_p6, %p845_p2 }
  0x22   : > { %p841_p1 = pneg %p840_p10 }
  0x24   : > { %p848_p8 = pnand %p847_p4, %p841_p1 }
  0x26   : > { %851 = shalt.err (!%p848_p8)
}
  0x27   : > { %s955_s4 = smov 384   ;;  %s956_s5 = smov 24  }
  0x28   : > { %769 = dma.hbm_to_vmem [thread:$0]  (!%p1028_p11), %s1193_s1, 6144, %s1021_s19, [#allocation6], %s955_s4, %s955_s4, %s956_s5  }
  0x29   : > { %p24_p2 = scmp.eq.s32.totalorder %s23_s23, 0  ;;  %p33_p1 = scmp.ne.s32.totalorder %s948_s11, %s944_s10 }
  0x2a   : > { %p34_p4 = scmp.eq.s32.totalorder %s952_s12, 0  ;;  %p779_p6 = scmp.lt.s32.totalorder %s952_s12, 2 }
  0x2b   : > { %s1064_s8 = scalar_select %p24_p2, %s948_s11, %s26_s22  }
  0x2c   : > { %p35_p8 = por %p34_p4, %p33_p1  ;;  %p1202_p10 = scmp.eq.s32.totalorder %s998_s13, 1 }
  0x2d   : > { %s123_s18 = sand.u32 1, %s948_s11   ;;  %s626_s24 = sshll.u32 %s952_s12, 7 }
  0x2e   : > { %p1068_p12 = por %p1202_p10, %p33_p1  ;;  %s625_s25 = sshll.u32 %s123_s18, 3 }
  0x2f   : > { %s1077_s27 = scalar_lea.hbm %s1192_s0, %s626_s24  ;;  %s127_s19 = scalar_lea.vmem [#allocation2], %s625_s25 }
  0x30   : > { %s134_s22 = sshll.u32 %s127_s19, 4  ;;  %p1079_p11 = pnand %p779_p6, %p35_p8  ;;  %s1083_s22 = int_to_ptr.vmem [resolvable:$true] %s134_s22 }
  0x31   : > { %s124_s28 = scalar_lea.sflag [#allocation3], %s123_s18  ;;  %s852_s29 = scalar_lea.hbm %s1077_s27, 128 }
  0x32   : > { %p853_p13 = scmp.ne.s32.totalorder %s1077_s27, %s852_s29  ;;  %p854_p0 = pneg %p1079_p11 }
  0x33   : > { %s857_s4 = scalar_lea.hbm %s1192_s0, 256  ;;  %p858_p7 = scmp.lt.u32.totalorder %s1077_s27, %s1192_s0 }
  0x34   : > { %p855_p3 = pnand %p854_p0, %p853_p13  ;;  %p859_p9 = scmp.lt.u32.totalorder %s857_s4, %s852_s29 }
  0x35   : > { %p861_p1 = scmp.lt.u32.totalorder %s852_s29, %s1077_s27 }
  0x36   : > { %p856_p5 = pneg %p855_p3  ;;  %p860_p2 = por %p859_p9, %p858_p7 }
  0x38   : > { %p862_p4 = por %p861_p1, %p860_p2 }
  0x3a   : > { %p863_p6 = pnand %p862_p4, %p856_p5 }
  0x3c   : > { %866 = shalt.err (!%p863_p6)
}
  0x3d   : > { %s867_s7 = scalar_lea.vmem %s1083_s22, 128  ;;  %s957_s18 = smov [#allocation2]  }
  0x3e   : > { %p868_p8 = scmp.ne.s32.totalorder %s1083_s22, %s867_s7  ;;  %s872_s24 = sshll.u32 %s957_s18, 4  ;;  %s873_s24 = int_to_ptr.vmem [resolvable:$false] %s872_s24 }
  0x3f   : > { %s874_s25 = scalar_lea.vmem %s873_s24, 256  ;;  %p875_p3 = scmp.lt.s32.totalorder %s1083_s22, %s873_s24 }
  0x40   : > { %p870_p10 = pnand %p868_p8, %p854_p0  ;;  %p876_p7 = scmp.lt.s32.totalorder %s874_s25, %s867_s7 }
  0x42   : > { %p871_p13 = pneg %p870_p10  ;;  %p877_p9 = por %p876_p7, %p875_p3 }
  0x44   : > { %p878_p2 = pnand %p877_p9, %p871_p13 }
  0x46   : > { %881 = shalt.err (!%p878_p2)
}
  0x47   : > { %773 = dma.hbm_to_vmem [thread:$0]  (!%p1079_p11), %s1077_s27, 128, %s1083_s22, %s124_s28  }
  0x48   : > { %p1205_p5 = scmp.ne.s32.totalorder %s1200_s17, 0 }
  0x49   : > { %s1113_s20 = sand.u32 (!%p1205_p5), 1, %s944_s10   ;;  %p1206_p0 = scmp.ne.s32.totalorder (!%p1205_p5), %s1198_s15, 0 }
  0x4a   : > { %143 = sbr.rel (%p1205_p5) target bundleno = 1091 (0x443), region = 28  ;;  %s628_s26 = sshll.u32 (!%p1205_p5), %s1113_s20, 3 }
  0x4b   : > { %s146_s19 = scalar_lea.sflag (!%p1205_p5), [#allocation3], %s1113_s20  ;;  %s1119_s29 = scalar_lea.vmem (!%p1205_p5), [#allocation2], %s628_s26 }
  0x51   : > { %927 = dma.done.wait (%p1206_p0), %s146_s19, 128  }
  0x52   : > { %929 = vsyncadd (%p1206_p0), %s146_s19, 4294967168  ;;  %p1207_p11 = scmp.eq.s32.totalorder %s998_s13, 0 }
  0x54   : > { %931 = dma.done.wait (%p1207_p11), [#allocation6], 6144   ;;  %p1208_p1 = pmov %p1207_p11 }
  0x55   : > { %v958_v0 = vmov 0.0   ;;  %v176_v1 = vld [vmem:[#allocation5 + $0x8] sm:$0xff]  ;;  %v179_v2 = vld [vmem:[#allocation5 + $0x20] sm:$0xff]  ;;  %v178_v5 = vld [vmem:[#allocation5 + $0x18] sm:$0xff]  ;;  %vm959_vm0 = vmmov 0   ;;  %v960_v55 = vmov 0.0|0.0  }
  0x56   : > { %933 = vsyncadd (%p1208_p1), [#allocation6], 4294961152  ;;  %287 = vmatprep.mubr.f32.mxu0 %v958_v0  ;;  %v175_v3 = vld [vmem:[#allocation5] sm:$0xff]  ;;  %v702_v4 = vpack.c.bf16 %v179_v2, %v176_v1  ;;  %v182_v6 = vld [vmem:[#allocation5 + $0x38] sm:$0xff]  ;;  %689 = vmatprep.mubr.msk.f32.mxu1 %vm959_vm0, %v958_v0  ;;  %vm441_vm2 = vcmask 64512   ;;  %s173_s15 = scalar_lea.vmem [#allocation7], %s628_s26 }
  0x57   : > { %v185_v7 = vld [vmem:[#allocation5 + $0x50] sm:$0xff]  ;;  %v704_v8 = vpack.c.bf16 %v178_v5, %v175_v3  ;;  %v184_v11 = vld [vmem:[#allocation5 + $0x48] sm:$0xff]  ;;  %v191_v13 = vld [vmem:[#allocation5 + $0x80] sm:$0xff]  ;;  %734 = vmatprep.subr.bf16.mxu1 %v960_v55  ;;  %s541_s17 = sshll.u32 %s173_s15, 4  ;;  %s633_s27 = sshll.u32 %s998_s13, 7  ;;  %s1145_s17 = int_to_ptr.vmem [resolvable:$true] %s541_s17 }
  0x58   : > { %v706_v9 = vpack.c.bf16 %v185_v7, %v182_v6  ;;  %v181_v10 = vld [vmem:[#allocation5 + $0x30] sm:$0xff]  ;;  %v188_v12 = vld [vmem:[#allocation5 + $0x68] sm:$0xff]  ;;  %703 = vmatprep.subr.bf16.mxu0 %v702_v4  ;;  %v187_v16 = vld [vmem:[#allocation5 + $0x60] sm:$0xff]  ;;  %s1150_s28 = scalar_lea.hbm %s1194_s2, %s633_s27  ;;  %s528_s30 = scalar_lea.sflag [#allocation4], %s1113_s20 }
  0x59   : > { %705 = vmatpush1.bf16.msra.mxu0 %v704_v8  ;;  %v708_v14 = vpack.c.bf16 %v184_v11, %v181_v10  ;;  %v710_v15 = vpack.c.bf16 %v191_v13, %v188_v12  ;;  %v190_v17 = vld [vmem:[#allocation5 + $0x78] sm:$0xff]  ;;  %v197_v19 = vld [vmem:[#allocation5 + $0xb0] sm:$0xff]  ;;  %v196_v23 = vld [vmem:[#allocation5 + $0xa8] sm:$0xff]  ;;  %s882_s3 = scalar_lea.vmem %s1145_s17, 128  ;;  %s961_s13 = smov [#allocation7]  }
  0x5a   : > { %707 = vmatprep.subr.bf16.mxu0 %v706_v9  ;;  %v194_v18 = vld [vmem:[#allocation5 + $0x98] sm:$0xff]  ;;  %v712_v20 = vpack.c.bf16 %v190_v17, %v187_v16  ;;  %v193_v22 = vld [vmem:[#allocation5 + $0x90] sm:$0xff]  ;;  %v200_v24 = vld [vmem:[#allocation5 + $0xc8] sm:$0xff]  ;;  %p883_p4 = scmp.ne.s32.totalorder %s1145_s17, %s882_s3  ;;  %s886_s4 = sshll.u32 %s961_s13, 4  ;;  %s887_s4 = int_to_ptr.vmem [resolvable:$false] %s886_s4 }
  0x5b   : > { %v714_v21 = vpack.c.bf16 %v197_v19, %v194_v18  ;;  %v203_v25 = vld [vmem:[#allocation5 + $0xe0] sm:$0xff]  ;;  %v716_v26 = vpack.c.bf16 %v196_v23, %v193_v22  ;;  %v202_v29 = vld [vmem:[#allocation5 + $0xd8] sm:$0xff]  ;;  %v209_v31 = vld [vmem:[#allocation5 + $0x110] sm:$0xff]  ;;  %s888_s5 = scalar_lea.vmem %s887_s4, 256  ;;  %p889_p10 = scmp.lt.s32.totalorder %s1145_s17, %s887_s4 }
  0x5c   : > { %v718_v27 = vpack.c.bf16 %v203_v25, %v200_v24  ;;  %v199_v28 = vld [vmem:[#allocation5 + $0xc0] sm:$0xff]  ;;  %v206_v30 = vld [vmem:[#allocation5 + $0xf8] sm:$0xff]  ;;  %v205_v34 = vld [vmem:[#allocation5 + $0xf0] sm:$0xff]  ;;  %p884_p6 = pnand %p883_p4, %p1068_p12  ;;  %p890_p13 = scmp.lt.s32.totalorder %s888_s5, %s882_s3 }
  0x5d   : > { %709 = vmatpush1.bf16.msra.mxu0 %v708_v14  ;;  %v720_v32 = vpack.c.bf16 %v202_v29, %v199_v28  ;;  %v722_v33 = vpack.c.bf16 %v209_v31, %v206_v30  ;;  %v208_v35 = vld [vmem:[#allocation5 + $0x108] sm:$0xff]  ;;  %v215_v37 = vld [vmem:[#allocation5 + $0x140] sm:$0xff]  ;;  %v214_v41 = vld [vmem:[#allocation5 + $0x138] sm:$0xff]  ;;  %v435_v14 = vlaneseq }
  0x5e   : > { %711 = vmatprep.subr.bf16.mxu0 %v710_v15  ;;  %v212_v36 = vld [vmem:[#allocation5 + $0x128] sm:$0xff]  ;;  %v724_v38 = vpack.c.bf16 %v208_v35, %v205_v34  ;;  %v211_v40 = vld [vmem:[#allocation5 + $0x120] sm:$0xff]  ;;  %v218_v42 = vld [vmem:[#allocation5 + $0x158] sm:$0xff]  ;;  %p885_p8 = pneg %p884_p6  ;;  %p891_p3 = por %p890_p13, %p889_p10 }
  0x5f   : > { %v726_v39 = vpack.c.bf16 %v215_v37, %v212_v36  ;;  %v221_v43 = vld [vmem:[#allocation5 + $0x170] sm:$0xff]  ;;  %v728_v44 = vpack.c.bf16 %v214_v41, %v211_v40  ;;  %v220_v47 = vld [vmem:[#allocation5 + $0x168] sm:$0xff]  ;;  %v183_v54 = vld [vmem:[#allocation5 + $0x40] sm:$0xff]  ;;  %v436_v15 = vshrl.u32 %v435_v14, 7  ;;  %v438_v16 = vand.u32 127, %v435_v14 }
  0x60   : > { %v730_v45 = vpack.c.bf16 %v221_v43, %v218_v42  ;;  %v217_v46 = vld [vmem:[#allocation5 + $0x150] sm:$0xff]  ;;  %v180_v53 = vld [vmem:[#allocation5 + $0x28] sm:$0xff]  ;;  %v186_v57 = vld [vmem:[#allocation5 + $0x58] sm:$0xff]  ;;  %p892_p7 = pnand %p891_p3, %p885_p8 }
  0x61   : > { %713 = vmatpush1.bf16.msra.mxu0 %v712_v20  ;;  %v732_v48 = vpack.c.bf16 %v220_v47, %v217_v46  ;;  %v174_v49 = vld [vmem:[%s1119_s29] sm:$0xff]  ;;  %v738_v58 = vpack.c.bf16 %v186_v57, %v183_v54  ;;  %v192_v60 = vld [vmem:[#allocation5 + $0x88] sm:$0xff]  ;;  %v195_v62 = vld [vmem:[#allocation5 + $0xa0] sm:$0xff]  ;;  %vm439_vm1 = vcmp.le.s32.totalorder %v438_v16, %v436_v15 }
  0x62   : > { %715 = vmatprep.subr.bf16.mxu0 %v714_v21  ;;  %v177_v52 = vld [vmem:[#allocation5 + $0x10] sm:$0xff]  ;;  %v198_v63 = vld [vmem:[#allocation5 + $0xb8] sm:$0xff]  ;;  %v204_v3 = vld [vmem:[#allocation5 + $0xe8] sm:$0xff] }
  0x63   : > { %v735_v56 = vpack.c.bf16 %v180_v53, %v177_v52  ;;  %v189_v59 = vld [vmem:[#allocation5 + $0x70] sm:$0xff]  ;;  %v744_v1 = vpack.c.bf16 %v198_v63, %v195_v62  ;;  %v207_v5 = vld [vmem:[#allocation5 + $0x100] sm:$0xff]  ;;  %v210_v6 = vld [vmem:[#allocation5 + $0x118] sm:$0xff] }
  0x64   : > { %v741_v61 = vpack.c.bf16 %v192_v60, %v189_v59  ;;  %v201_v2 = vld [vmem:[#allocation5 + $0xd0] sm:$0xff]  ;;  %v750_v7 = vpack.c.bf16 %v210_v6, %v207_v5  ;;  %v216_v9 = vld [vmem:[#allocation5 + $0x148] sm:$0xff]  ;;  %v219_v11 = vld [vmem:[#allocation5 + $0x160] sm:$0xff] }
  0x65   : > { %717 = vmatpush1.bf16.msra.mxu0 %v716_v26  ;;  %736 = vmatpush3.bf16.msra.mxu1 %v735_v56  ;;  %v747_v4 = vpack.c.bf16 %v204_v3, %v201_v2  ;;  %v213_v8 = vld [vmem:[#allocation5 + $0x130] sm:$0xff]  ;;  %v222_v12 = vld [vmem:[#allocation5 + $0x178] sm:$0xff] }
  0x66   : > { %719 = vmatprep.subr.bf16.mxu0 %v718_v27  ;;  %737 = vmatprep.subr.bf16.mxu1 %v960_v55  ;;  %v753_v10 = vpack.c.bf16 %v216_v9, %v213_v8  ;;  %v756_v13 = vpack.c.bf16 %v222_v12, %v219_v11 }
  0x69   : > { %721 = vmatpush1.bf16.msra.mxu0 %v720_v32  ;;  %739 = vmatpush3.bf16.msra.mxu1 %v738_v58 }
  0x6a   : > { %723 = vmatprep.subr.bf16.mxu0 %v722_v33  ;;  %740 = vmatprep.subr.bf16.mxu1 %v960_v55 }
  0x6d   : > { %725 = vmatpush1.bf16.msra.mxu0 %v724_v38  ;;  %742 = vmatpush3.bf16.msra.mxu1 %v741_v61 }
  0x6e   : > { %727 = vmatprep.subr.bf16.mxu0 %v726_v39  ;;  %743 = vmatprep.subr.bf16.mxu1 %v960_v55 }
  0x71   : > { %729 = vmatpush1.bf16.msra.mxu0 %v728_v44  ;;  %745 = vmatpush3.bf16.msra.mxu1 %v744_v1 }
  0x72   : > { %731 = vmatprep.subr.bf16.mxu0 %v730_v45  ;;  %746 = vmatprep.subr.bf16.mxu1 %v960_v55 }
  0x75   : > { %733 = vmatpush1.bf16.msra.mxu0 %v732_v48  ;;  %748 = vmatpush3.bf16.msra.mxu1 %v747_v4 }
  0x76   : > { %692 = vmatprep.subr.mxu0 %v958_v0  ;;  %749 = vmatprep.subr.bf16.mxu1 %v960_v55 }
  0x78   : > { %288 = vmatmul.mubr.f32.vlgmr.msra.gmra.mrb[0].mxu0 %v174_v49 }
  0x79   : > { %694 = vmatprep.mubr.msk.f32.mxu0 %vm959_vm0, %v958_v0  ;;  %751 = vmatpush3.bf16.msra.mxu1 %v750_v7 }
  0x7a   : > { %752 = vmatprep.subr.bf16.mxu1 %v960_v55 }
  0x7d   : > { %754 = vmatpush3.bf16.msra.mxu1 %v753_v10 }
  0x7e   : > { %755 = vmatprep.subr.bf16.mxu1 %v960_v55 }
  0x81   : > { %757 = vmatpush3.bf16.msra.mxu1 %v756_v13 }
  0x82   : > { %697 = vmatprep.subr.mxu1 %v958_v0 }
  0x84   : > { %690 = vmatmul.mubr.f32.vlgmr.msra.gmra.mrb[0].mxu1 %v174_v49 }
  0x85   : > { %699 = vmatprep.mubr.msk.f32.mxu1 %vm959_vm0, %v958_v0 }
 0x14b   : > { %v289_v50 = vpop.f32.mrb[0].mxu0 }
 0x14c   : > { %v291_v51 = vpop.f32.mrb[1].mxu0 }
 0x14d   : > { %693 = vmatpush3.xpose.msra.mxu0 %v291_v51 }
 0x150   : > { %695 = vmatmul.mubr.f32.vlgmr.msra.gmra.mrb[2].mxu0 %v289_v50 }
 0x157   : > { %v360_v26 = vpop.f32.mrb[0].mxu1 }
 0x158   : > { %v691_v27 = vpop.f32.mrb[1].mxu1  ;;  %698 = vmatpush3.msra.mxu1 %v360_v26 }
 0x223   : > { %v430_v17 = vpop.f32.mrb[2].mxu0 }
 0x224   : > { %v434_v18 = vmul.f32 0.1, %v430_v17  ;;  %v696_v19 = vpop.f32.mrb[3].mxu0 }
 0x226   : > { %v440_v20 = vsel %vm439_vm1, %v434_v18, -1e+30 }
 0x227   : > { %v442_v21 = vsel %vm441_vm2, %v440_v20, -inf }
 0x228   : > { %443 = vmax.xlane.f32.xlu0 %v442_v21 }
 0x2b5   : > { %v444_v22 = vpop.xlane.xlu0 %443 }
 0x2b6   : > { %v445_v23 = vsub.f32 %v440_v20, %v444_v22 }
 0x2b8   : > { %v446_v24 = vmul.f32 1.442695, %v445_v23 }
 0x2ba   : > { %820 = vpow2.f32 %v446_v24 }
 0x2c4   : > { %v821_v25 = vpop.eup %820 }
 0x2c5   : > { %v448_v0 = vsel %vm441_vm2, %v821_v25, 0.0 }
 0x2c6   : > { %449 = vadd.xlane.f32.xlu0 %v448_v0 }
 0x353   : > { %v450_v28 = vpop.xlane.xlu0 %449 }
 0x354   : > { %822 = vrcp.f32 %v450_v28 }
 0x35e   : > { %v823_v29 = vpop.eup %822 }
 0x35f   : > { %v452_v30 = vmul.f32 %v823_v29, %v821_v25 }
 0x361   : > { %700 = vmatmul.mubr.msk.f32.vlgmr.msra.gmra.mrb[2].mxu1 %vm441_vm2, %v452_v30 }
 0x434   : > { %v522_v31 = vpop.f32.mrb[2].mxu1 }
 0x435   : > { %526 = vst [vmem:[%s173_s15] sm:$0xff] %v522_v31  ;;  %v701_v32 = vpop.f32.mrb[3].mxu1 }
 0x436   : > { %895 = shalt.err (!%p892_p7)
}
 0x437   : > { %s896_s6 = scalar_lea.hbm %s1150_s28, 128  ;;  %s900_s24 = scalar_lea.hbm %s1194_s2, 256 }
 0x438   : > { %p897_p9 = scmp.ne.s32.totalorder %s1150_s28, %s896_s6  ;;  %p901_p0 = scmp.lt.u32.totalorder %s1150_s28, %s1194_s2 }
 0x439   : > { %p902_p11 = scmp.lt.u32.totalorder %s900_s24, %s896_s6  ;;  %p904_p4 = scmp.lt.u32.totalorder %s896_s6, %s1150_s28 }
 0x43a   : > { %p898_p2 = pnand %p897_p9, %p1068_p12 }
 0x43b   : > { %p903_p1 = por %p902_p11, %p901_p0 }
 0x43c   : > { %p899_p5 = pneg %p898_p2 }
 0x43d   : > { %p905_p6 = por %p904_p4, %p903_p1 }
 0x43f   : > { %p906_p8 = pnand %p905_p6, %p899_p5 }
 0x441   : > { %909 = shalt.err (!%p906_p8)
}
 0x442   : > { %764 = dma.vmem_to_hbm [thread:$0]  (%p1068_p12), %s1145_s17, 128, %s1150_s28, %s528_s30  }
 0x443 PF: > { %s553_s26 = sand.u32 1, %s940_s9   ;;  %p1209_p10 = scmp.ne.s32.totalorder %s1199_s16, 0 }
 0x444   : > { %p1210_p13 = scmp.ge.s32.totalorder %s952_s12, 2  ;;  %s554_s19 = scalar_lea.sflag [#allocation4], %s553_s26 }
 0x446   : > { %p775_p3 = pnand %p1210_p13, %p1209_p10 }
 0x448   : > { %935 = dma.done.wait (!%p775_p3), %s554_s19, 128  }
 0x449   : > { %937 = vsyncadd (!%p775_p3), %s554_s19, 4294967168  ;;  %p16_p7 = scmp.ge.s32.totalorder %s1033_s21, 4   ;;  %s1211_s9 = smov %s944_s10 }
 0x44a   : > { %s1212_s10 = smov %s948_s11  ;;  %s1213_s11 = smov %s1064_s8 }
 0x44b   : > { %s1214_s12 = smov %s1033_s21  ;;  %18 = sbr.rel (!%p16_p7) target bundleno = 6 (0x6), region = 77 }
 0x452   :  { %559 = vsyncpa [#allocation3], 1 }
 0x453   :  { %561 = vsyncpa [#allocation3 + $0x1], 1 }
 0x454   :  { %562 = vsyncpa [#allocation6], 1 }
 0x455   :  { %563 = vsyncpa [#allocation4], 1 }
 0x456   :  { %565 = vsyncpa [#allocation4 + $0x1], 1 }

</bundles_post_ra>
